<compile_context>
chip_gen: v7x
topology: tpu7x:2x2x1
jax: 0.10.0
libtpu: 0.0.40
codegen_flags: <defaults>
</compile_context>

<pallas_src>
import numpy as np
import jax
import jax.numpy as jnp
from jax import lax
from jax.experimental import pallas as pl
from jax.experimental.pallas import tpu as pltpu

NUM_THETA = 100
NUM_ALPHA = 50
TAB_SIZE = NUM_THETA * NUM_ALPHA          # 5000 entries in MTS_TRANS

# Packed transmission table, resident in VMEM as bf16 (TAB_ROWS, TAB_COLS):
#   rows 0..99    : MTS_TRANS as tab[t, a]   (theta on sublanes)
#   row  100      : MTS_DIFF_TRANS[a]
#   rows 101..111 : zero padding (tx <= 99 so they are never selected)
#   cols 0..49    : bf16 "hi" part of the f32 table values
#   cols 64..113  : bf16 "lo" residual (value - hi)
# sel = tab_bf16 @ twohot_bf16 (one MXU pass, K=128, f32 accumulate)
# reconstructs the f32 table value as hi + lo to ~2^-17 relative accuracy.
TAB_ROWS = 112                            # multiple of 16 (bf16 sublane tile)
TAB_COLS = 128
DIFF_ROW = NUM_THETA                      # row holding MTS_DIFF_TRANS
LO_OFF = 64                               # column offset of the "lo" block

M_ETA = 1.48958738
M_INV_ETA2 = 1.0 / (M_ETA * M_ETA)
F_CONST = 0.03867
PI = float(np.pi)

# Channel layout of the packed (24, N) input slab.
# Every vector/scalar lives inside a single 8-sublane group (no straddling).
IN_ROWS = 24
_LIGHT = slice(0, 3)       # group 0
_DIST = slice(3, 4)
_ALPHA = slice(4, 5)
_NORMAL = slice(8, 11)     # group 1
_VIEW = slice(12, 15)
_DIFF_ALB = slice(16, 19)  # group 2
_SPEC_ALB = slice(20, 23)

# Output slab layout (12, N); pad rows 3, 7, 11 are never written/read.
OUT_ROWS = 12
_O_DIFF = slice(0, 3)
_O_SPEC = slice(4, 7)
_O_RGB = slice(8, 11)


def _pow_quarter(x):
    # x ** 0.25 (same formulation in kernel and reference)
    return jnp.sqrt(jnp.sqrt(x))


def _ggx_kernel(x_ref, tab_ref, out_ref):
    light = x_ref[_LIGHT, :]          # (3, T)
    dist = x_ref[_DIST, :]            # (1, T)
    normal = x_ref[_NORMAL, :]        # (3, T)
    view = x_ref[_VIEW, :]            # (3, T)
    diff_alb = x_ref[_DIFF_ALB, :]    # (3, T)
    spec_alb = x_ref[_SPEC_ALB, :]    # (3, T)
    alpha = x_ref[_ALPHA, :]          # (1, T)

    # Single reciprocal for the light fall-off (shared by the 3 channels).
    inv_d2 = 1.0 / (dist * dist + 1e-10)                 # (1, T)
    light_intensity = light * inv_d2                     # (3, T)

    dot = jnp.sum(view * normal, axis=0, keepdims=True)  # (1, T)
    dot = jnp.clip(dot, 1e-5, 0.99999)
    alpha = jnp.maximum(alpha, 1e-4)

    alpha2 = alpha * alpha
    cos2 = dot * dot
    root = cos2 + (1.0 - cos2) / (alpha2 + 1e-10)
    D = 1.0 / (PI * alpha2 * root * root + 1e-10)

    # smithG1(dot, alpha) ** 2   (hypot(r, 1) == sqrt(r*r + 1))
    sin_t = jnp.sqrt(1.0 - cos2)
    tan_t = sin_t / (dot + 1e-10)
    g_root = alpha * tan_t
    G1 = 2.0 / (1.0 + jnp.sqrt(g_root * g_root + 1.0))
    G = G1 * G1

    spec_s = F_CONST * D * G / (4.0 * dot + 1e-10)       # (1, T)
    specular = light_intensity * spec_alb * spec_s       # (3, T)

    # ---- transmission-table lookups -------------------------------------
    warped_cos = _pow_quarter(dot)
    warped_alpha = _pow_quarter(alpha * 0.25)
    tx_f = jnp.floor(warped_cos * NUM_THETA)             # always in [5, 99]
    ty_f = jnp.floor(warped_alpha * NUM_ALPHA)            # >= 0, may exceed 49
    overflow = ty_f > (NUM_ALPHA - 1)
    ty = jnp.minimum(ty_f, NUM_ALPHA - 1).astype(jnp.int32)           # (1, T)
    tx = jnp.where(overflow, NUM_THETA - 1, tx_f.astype(jnp.int32))   # (1, T)
    # (matches the reference clamp of ty*100+tx into [0, 4999])

    # Stage 1: per-ray alpha-column select, single bf16 MXU pass (K=128).
    # Two-hot picks column ty (hi) and column ty+64 (lo); f32 accumulation
    # reconstructs the f32 table value (hi + lo) to ~2^-17 rel error.
    iota_a = lax.broadcasted_iota(jnp.int32, (TAB_COLS, 1), 0)        # (128, 1)
    twohot = ((iota_a & (LO_OFF - 1)) == ty)                          # (128, T)
    twohot = twohot.astype(jnp.float32).astype(jnp.bfloat16)
    sel = jnp.dot(tab_ref[...], twohot,
                  preferred_element_type=jnp.float32)                 # (112, T)

    # Stage 2: per-ray theta select via compare + select + sublane reduce.
    iota_t = lax.broadcasted_iota(jnp.int32, (TAB_ROWS, 1), 0)        # (112, 1)
    T12 = jnp.sum(jnp.where(iota_t == tx, sel, 0.0), axis=0, keepdims=True)
    T12 = jnp.clip(T12, 0.0, 1.0)                                     # (1, T)
    # Row DIFF_ROW of `sel` already holds MTS_DIFF_TRANS[ty].
    diff_val = sel[DIFF_ROW:DIFF_ROW + 1, :]                          # (1, T)
    Fdr = jnp.clip(1.0 - diff_val, 0.0, 1.0)

    diff_s = dot * T12 * T12 * (M_INV_ETA2 / PI) / (1.0 - Fdr + 1e-10)
    diffuse = light_intensity * diff_alb * diff_s                     # (3, T)

    out_ref[_O_DIFF, :] = diffuse
    out_ref[_O_SPEC, :] = specular
    out_ref[_O_RGB, :] = diffuse + specular


def ggx_colocated_render(light, distance, normal, viewdir,
                         diffuse_albedo, specular_albedo, specular_roughness,
                         mts_trans, mts_diff_trans, *, tile=4096):
    """Pallas implementation of GGXColocatedRenderer.forward."""
    dots_sh = light.shape[:-1]
    n = int(np.prod(dots_sh)) if dots_sh else 1

    def chan(x):
        # (..., C) -> channel-major (C, n): rays on the lane dimension.
        return jnp.asarray(x, jnp.float32).reshape(n, -1).T

    z1 = jnp.zeros((1, n), jnp.float32)
    z3 = jnp.zeros((3, n), jnp.float32)
    # NOTE: this packing (and unflat below) is an extra HBM pass outside the
    # kernel; for per-frame use keep data resident in this layout upstream.
    packed = jnp.concatenate(
        [chan(light), chan(distance), chan(specular_roughness), z3,     # 0..7
         chan(normal), z1, chan(viewdir), z1,                           # 8..15
         chan(diffuse_albedo), z1, chan(specular_albedo), z1],          # 16..23
        axis=0)                                                         # (24, n)

    # Lane-dense tiling: tile is a multiple of 128 rays.
    LANE = 128
    n128 = ((n + LANE - 1) // LANE) * LANE
    tile_eff = max(LANE, (min(int(tile), n128) // LANE) * LANE)
    # v7x shards "parallel" grid axes across its two TensorCores: guarantee
    # at least two grid steps whenever there is enough data.
    if n128 >= 2 * LANE and tile_eff >= n128:
        tile_eff = ((n128 // 2 + LANE - 1) // LANE) * LANE
    n_pad = ((n128 + tile_eff - 1) // tile_eff) * tile_eff
    if n_pad > n:
        packed = jnp.pad(packed, ((0, 0), (0, n_pad - n)))

    # Pack both transmission tables into one bf16 hi/lo (112, 128) table.
    trans2d = jnp.asarray(mts_trans, jnp.float32).reshape(NUM_ALPHA, NUM_THETA)
    tab32 = jnp.zeros((TAB_ROWS, NUM_ALPHA), jnp.float32)
    tab32 = tab32.at[:NUM_THETA, :].set(trans2d.T)       # tab32[t, a]
    tab32 = tab32.at[DIFF_ROW, :].set(jnp.asarray(mts_diff_trans, jnp.float32))
    hi = tab32.astype(jnp.bfloat16)
    lo = (tab32 - hi.astype(jnp.float32)).astype(jnp.bfloat16)
    tab = jnp.zeros((TAB_ROWS, TAB_COLS), jnp.bfloat16)
    tab = tab.at[:, :NUM_ALPHA].set(hi)
    tab = tab.at[:, LO_OFF:LO_OFF + NUM_ALPHA].set(lo)

    grid = (n_pad // tile_eff,)
    out = pl.pallas_call(
        _ggx_kernel,
        out_shape=jax.ShapeDtypeStruct((OUT_ROWS, n_pad), jnp.float32),
        grid_spec=pltpu.PrefetchScalarGridSpec(
            num_scalar_prefetch=0,
            grid=grid,
            in_specs=[pl.BlockSpec((IN_ROWS, tile_eff), lambda i: (0, i)),
                      pl.BlockSpec((TAB_ROWS, TAB_COLS), lambda i: (0, 0))],
            out_specs=pl.BlockSpec((OUT_ROWS, tile_eff), lambda i: (0, i)),
        ),
        compiler_params=pltpu.CompilerParams(
            dimension_semantics=("parallel",),
            vmem_limit_bytes=32 * 1024 * 1024),
    )(packed, tab)

    o = out[:, :n]

    def unflat(rows):
        return o[rows].T.reshape(*dots_sh, 3)

    return {
        "diffuse_rgb": unflat(_O_DIFF),
        "specular_rgb": unflat(_O_SPEC),
        "rgb": unflat(_O_RGB),
    }


def ggx_reference(light, distance, normal, viewdir,
                  diffuse_albedo, specular_albedo, alpha,
                  mts_trans, mts_diff_trans):
    """Pure-JAX reference mirroring the PyTorch forward."""
    light_intensity = light / (distance * distance + 1e-10)
    dot = jnp.sum(viewdir * normal, axis=-1, keepdims=True)
    dot = jnp.clip(dot, 1e-5, 0.99999)
    alpha = jnp.maximum(alpha, 1e-4)
    cos2 = dot * dot
    root = cos2 + (1.0 - cos2) / (alpha * alpha + 1e-10)
    D = 1.0 / (PI * alpha * alpha * root * root + 1e-10)
    sinTheta = jnp.sqrt(1.0 - cos2)
    tanTheta = sinTheta / (dot + 1e-10)
    g_root = alpha * tanTheta
    G1 = 2.0 / (1.0 + jnp.sqrt(g_root * g_root + 1.0))
    G = G1 * G1
    specular = light_intensity * specular_albedo * F_CONST * D * G / (4.0 * dot + 1e-10)

    warped_cos = _pow_quarter(dot)
    warped_alpha = _pow_quarter(alpha / 4.0)
    tx = jnp.floor(warped_cos * NUM_THETA).astype(jnp.int32)
    ty = jnp.floor(warped_alpha * NUM_ALPHA).astype(jnp.int32)
    t_idx = jnp.clip(ty * NUM_THETA + tx, 0, TAB_SIZE - 1)
    T12 = jnp.clip(mts_trans[t_idx[..., 0]][..., None], 0.0, 1.0)
    T21 = T12
    d_idx = jnp.clip(ty, 0, NUM_ALPHA - 1)
    Fdr = jnp.clip(1.0 - mts_diff_trans[d_idx[..., 0]][..., None], 0.0, 1.0)
    diffuse = (light_intensity * (diffuse_albedo / (1.0 - Fdr + 1e-10) / PI)
               * dot * T12 * T21 * M_INV_ETA2)
    return {"diffuse_rgb": diffuse, "specular_rgb": specular,
            "rgb": diffuse + specular}


if __name__ == "__main__":
    key = jax.random.PRNGKey(0)
    ks = jax.random.split(key, 9)
    B, R = 2, 100   # flattened N = 200 rays (exercises pad + 2-step grid path)

    light = jax.random.uniform(ks[0], (B, R, 3), jnp.float32, 0.5, 5.0)
    distance = jax.random.uniform(ks[1], (B, R, 1), jnp.float32, 0.5, 3.0)
    normal = jax.random.normal(ks[2], (B, R, 3), jnp.float32)
    normal = normal / jnp.linalg.norm(normal, axis=-1, keepdims=True)
    viewdir = jax.random.normal(ks[3], (B, R, 3), jnp.float32)
    viewdir = viewdir / jnp.linalg.norm(viewdir, axis=-1, keepdims=True)
    diffuse_albedo = jax.random.uniform(ks[4], (B, R, 3), jnp.float32, 0.0, 1.0)
    specular_albedo = jax.random.uniform(ks[5], (B, R, 3), jnp.float32, 0.0, 1.0)
    specular_roughness = jax.random.uniform(ks[6], (B, R, 1), jnp.float32, 0.01, 1.0)

    # Synthetic deterministic stand-ins for ggx/*.txt tables (not read from disk).
    mts_trans = jax.random.uniform(ks[7], (TAB_SIZE,), jnp.float32, 0.0, 1.0)
    mts_diff_trans = jax.random.uniform(ks[8], (NUM_ALPHA,), jnp.float32, 0.0, 1.0)

    out = ggx_colocated_render(light, distance, normal, viewdir,
                               diffuse_albedo, specular_albedo,
                               specular_roughness, mts_trans, mts_diff_trans)
    jax.block_until_ready(out)

    ref = ggx_reference(light, distance, normal, viewdir,
                        diffuse_albedo, specular_albedo,
                        specular_roughness, mts_trans, mts_diff_trans)
    for k in ("diffuse_rgb", "specular_rgb", "rgb"):
        np.testing.assert_allclose(np.asarray(out[k]), np.asarray(ref[k]),
                                    rtol=1e-4, atol=1e-5)

    print("KERNEL_OK")
</pallas_src>

<mosaic_0001>
module attributes {stable_mosaic.version = 11 : i64} {
  func.func @_ggx_kernel(%arg0: i32, %arg1: memref<24x128xf32, #tpu.memory_space<vmem>>, %arg2: memref<112x128xbf16, #tpu.memory_space<vmem>>, %arg3: memref<12x128xf32, #tpu.memory_space<vmem>>) attributes {dimension_semantics = [#tpu.dimension_semantics<parallel>], iteration_bounds = array<i64: 2>, scalar_prefetch = 0 : i64, scratch_operands = 0 : i64, tpu.core_type = #tpu.core_type<tc>, window_params = [{transform_indices = @transform_0, window_bounds = array<i64: 24, 128>}, {pipeline_mode = #tpu.pipeline_mode<synchronous>, transform_indices = @transform_1, window_bounds = array<i64: 112, 128>}, {transform_indices = @transform_2, window_bounds = array<i64: 12, 128>}]} {
    %c0 = arith.constant 0 : index
    %c0_0 = arith.constant 0 : index
    %0 = vector.load %arg1[%c0, %c0_0] : memref<24x128xf32, #tpu.memory_space<vmem>>, vector<3x128xf32>
    %c3 = arith.constant 3 : index
    %c0_1 = arith.constant 0 : index
    %1 = vector.load %arg1[%c3, %c0_1] : memref<24x128xf32, #tpu.memory_space<vmem>>, vector<1x128xf32>
    %c8 = arith.constant 8 : index
    %c0_2 = arith.constant 0 : index
    %2 = vector.load %arg1[%c8, %c0_2] : memref<24x128xf32, #tpu.memory_space<vmem>>, vector<3x128xf32>
    %c12 = arith.constant 12 : index
    %c0_3 = arith.constant 0 : index
    %3 = vector.load %arg1[%c12, %c0_3] : memref<24x128xf32, #tpu.memory_space<vmem>>, vector<3x128xf32>
    %c16 = arith.constant 16 : index
    %c0_4 = arith.constant 0 : index
    %4 = vector.load %arg1[%c16, %c0_4] : memref<24x128xf32, #tpu.memory_space<vmem>>, vector<3x128xf32>
    %c20 = arith.constant 20 : index
    %c0_5 = arith.constant 0 : index
    %5 = vector.load %arg1[%c20, %c0_5] : memref<24x128xf32, #tpu.memory_space<vmem>>, vector<3x128xf32>
    %c4 = arith.constant 4 : index
    %c0_6 = arith.constant 0 : index
    %6 = vector.load %arg1[%c4, %c0_6] : memref<24x128xf32, #tpu.memory_space<vmem>>, vector<1x128xf32>
    %7 = arith.mulf %1, %1 : vector<1x128xf32>
    %cst = arith.constant 1.000000e-10 : f32
    %8 = vector.broadcast %cst : f32 to vector<1x128xf32>
    %9 = arith.addf %7, %8 : vector<1x128xf32>
    %cst_7 = arith.constant 1.000000e+00 : f32
    %10 = vector.broadcast %cst_7 : f32 to vector<1x128xf32>
    %11 = arith.divf %10, %9 : vector<1x128xf32>
    %12 = vector.broadcast %11 : vector<1x128xf32> to vector<3x128xf32>
    %13 = arith.mulf %0, %12 : vector<3x128xf32>
    %14 = arith.mulf %3, %2 : vector<3x128xf32>
    %cst_8 = arith.constant dense<0.000000e+00> : vector<128xf32>
    %15 = vector.multi_reduction <add>, %14, %cst_8 [0] : vector<3x128xf32> to vector<128xf32>
    %16 = vector.shape_cast %15 : vector<128xf32> to vector<1x128xf32>
    %cst_9 = arith.constant 9.99999974E-6 : f32
    %cst_10 = arith.constant 0.999989986 : f32
    %17 = vector.broadcast %cst_9 : f32 to vector<1x128xf32>
    %18 = arith.maximumf %17, %16 : vector<1x128xf32>
    %19 = vector.broadcast %cst_10 : f32 to vector<1x128xf32>
    %20 = arith.minimumf %19, %18 : vector<1x128xf32>
    %cst_11 = arith.constant 9.99999974E-5 : f32
    %21 = vector.broadcast %cst_11 : f32 to vector<1x128xf32>
    %22 = arith.maximumf %6, %21 : vector<1x128xf32>
    %23 = arith.mulf %22, %22 : vector<1x128xf32>
    %24 = arith.mulf %20, %20 : vector<1x128xf32>
    %cst_12 = arith.constant 1.000000e+00 : f32
    %25 = vector.broadcast %cst_12 : f32 to vector<1x128xf32>
    %26 = arith.subf %25, %24 : vector<1x128xf32>
    %cst_13 = arith.constant 1.000000e-10 : f32
    %27 = vector.broadcast %cst_13 : f32 to vector<1x128xf32>
    %28 = arith.addf %23, %27 : vector<1x128xf32>
    %29 = arith.divf %26, %28 : vector<1x128xf32>
    %30 = arith.addf %24, %29 : vector<1x128xf32>
    %cst_14 = arith.constant 3.14159274 : f32
    %31 = vector.broadcast %cst_14 : f32 to vector<1x128xf32>
    %32 = arith.mulf %31, %23 : vector<1x128xf32>
    %33 = arith.mulf %32, %30 : vector<1x128xf32>
    %34 = arith.mulf %33, %30 : vector<1x128xf32>
    %cst_15 = arith.constant 1.000000e-10 : f32
    %35 = vector.broadcast %cst_15 : f32 to vector<1x128xf32>
    %36 = arith.addf %34, %35 : vector<1x128xf32>
    %cst_16 = arith.constant 1.000000e+00 : f32
    %37 = vector.broadcast %cst_16 : f32 to vector<1x128xf32>
    %38 = arith.divf %37, %36 : vector<1x128xf32>
    %cst_17 = arith.constant 1.000000e+00 : f32
    %39 = vector.broadcast %cst_17 : f32 to vector<1x128xf32>
    %40 = arith.subf %39, %24 : vector<1x128xf32>
    %41 = math.sqrt %40 : vector<1x128xf32>
    %cst_18 = arith.constant 1.000000e-10 : f32
    %42 = vector.broadcast %cst_18 : f32 to vector<1x128xf32>
    %43 = arith.addf %20, %42 : vector<1x128xf32>
    %44 = arith.divf %41, %43 : vector<1x128xf32>
    %45 = arith.mulf %22, %44 : vector<1x128xf32>
    %46 = arith.mulf %45, %45 : vector<1x128xf32>
    %cst_19 = arith.constant 1.000000e+00 : f32
    %47 = vector.broadcast %cst_19 : f32 to vector<1x128xf32>
    %48 = arith.addf %46, %47 : vector<1x128xf32>
    %49 = math.sqrt %48 : vector<1x128xf32>
    %cst_20 = arith.constant 1.000000e+00 : f32
    %50 = vector.broadcast %cst_20 : f32 to vector<1x128xf32>
    %51 = arith.addf %50, %49 : vector<1x128xf32>
    %cst_21 = arith.constant 2.000000e+00 : f32
    %52 = vector.broadcast %cst_21 : f32 to vector<1x128xf32>
    %53 = arith.divf %52, %51 : vector<1x128xf32>
    %54 = arith.mulf %53, %53 : vector<1x128xf32>
    %cst_22 = arith.constant 3.867000e-02 : f32
    %55 = vector.broadcast %cst_22 : f32 to vector<1x128xf32>
    %56 = arith.mulf %55, %38 : vector<1x128xf32>
    %57 = arith.mulf %56, %54 : vector<1x128xf32>
    %cst_23 = arith.constant 4.000000e+00 : f32
    %58 = vector.broadcast %cst_23 : f32 to vector<1x128xf32>
    %59 = arith.mulf %58, %20 : vector<1x128xf32>
    %cst_24 = arith.constant 1.000000e-10 : f32
    %60 = vector.broadcast %cst_24 : f32 to vector<1x128xf32>
    %61 = arith.addf %59, %60 : vector<1x128xf32>
    %62 = arith.divf %57, %61 : vector<1x128xf32>
    %63 = arith.mulf %13, %5 : vector<3x128xf32>
    %64 = vector.broadcast %62 : vector<1x128xf32> to vector<3x128xf32>
    %65 = arith.mulf %63, %64 : vector<3x128xf32>
    %66 = math.sqrt %20 : vector<1x128xf32>
    %67 = math.sqrt %66 : vector<1x128xf32>
    %cst_25 = arith.constant 2.500000e-01 : f32
    %68 = vector.broadcast %cst_25 : f32 to vector<1x128xf32>
    %69 = arith.mulf %22, %68 : vector<1x128xf32>
    %70 = math.sqrt %69 : vector<1x128xf32>
    %71 = math.sqrt %70 : vector<1x128xf32>
    %cst_26 = arith.constant 1.000000e+02 : f32
    %72 = vector.broadcast %cst_26 : f32 to vector<1x128xf32>
    %73 = arith.mulf %67, %72 : vector<1x128xf32>
    %74 = math.floor %73 : vector<1x128xf32>
    %cst_27 = arith.constant 5.000000e+01 : f32
    %75 = vector.broadcast %cst_27 : f32 to vector<1x128xf32>
    %76 = arith.mulf %71, %75 : vector<1x128xf32>
    %77 = math.floor %76 : vector<1x128xf32>
    %cst_28 = arith.constant 4.900000e+01 : f32
    %78 = vector.broadcast %cst_28 : f32 to vector<1x128xf32>
    %79 = arith.cmpf ogt, %77, %78 : vector<1x128xf32>
    %cst_29 = arith.constant 4.900000e+01 : f32
    %80 = vector.broadcast %cst_29 : f32 to vector<1x128xf32>
    %81 = arith.minimumf %77, %80 : vector<1x128xf32>
    %82 = arith.fptosi %81 : vector<1x128xf32> to vector<1x128xi32>
    %83 = arith.fptosi %74 : vector<1x128xf32> to vector<1x128xi32>
    %c99_i32 = arith.constant 99 : i32
    %84 = vector.broadcast %c99_i32 : i32 to vector<1x128xi32>
    %85 = arith.select %79, %84, %83 : vector<1x128xi1>, vector<1x128xi32>
    %86 = tpu.iota {dimensions = array<i32: 0>} : vector<128x1xi32>
    %c63_i32 = arith.constant 63 : i32
    %87 = vector.broadcast %c63_i32 : i32 to vector<128x1xi32>
    %88 = arith.andi %86, %87 : vector<128x1xi32>
    %89 = vector.broadcast %88 : vector<128x1xi32> to vector<128x128xi32>
    %90 = vector.broadcast %82 : vector<1x128xi32> to vector<128x128xi32>
    %91 = arith.cmpi eq, %89, %90 : vector<128x128xi32>
    %92 = arith.extui %91 : vector<128x128xi1> to vector<128x128xi32>
    %93 = arith.sitofp %92 : vector<128x128xi32> to vector<128x128xf32>
    %94 = arith.truncf %93 : vector<128x128xf32> to vector<128x128xbf16>
    %c0_30 = arith.constant 0 : index
    %c0_31 = arith.constant 0 : index
    %95 = vector.load %arg2[%c0_30, %c0_31] : memref<112x128xbf16, #tpu.memory_space<vmem>>, vector<112x128xbf16>
    %cst_32 = arith.constant dense<0.000000e+00> : vector<112x128xf32>
    %96 = tpu.matmul %95, %94, %cst_32 {dimension_numbers = #tpu.dot_dimension_numbers<[1], [0], [0], [1], [0, 0, 1, 1], [], []>} : vector<112x128xbf16>, vector<128x128xbf16>, vector<112x128xf32> -> vector<112x128xf32>
    %97 = tpu.iota {dimensions = array<i32: 0>} : vector<112x1xi32>
    %98 = vector.broadcast %97 : vector<112x1xi32> to vector<112x128xi32>
    %99 = vector.broadcast %85 : vector<1x128xi32> to vector<112x128xi32>
    %100 = arith.cmpi eq, %98, %99 : vector<112x128xi32>
    %cst_33 = arith.constant 0.000000e+00 : f32
    %101 = vector.broadcast %cst_33 : f32 to vector<112x128xf32>
    %102 = arith.select %100, %96, %101 : vector<112x128xi1>, vector<112x128xf32>
    %cst_34 = arith.constant dense<0.000000e+00> : vector<128xf32>
    %103 = vector.multi_reduction <add>, %102, %cst_34 [0] : vector<112x128xf32> to vector<128xf32>
    %104 = vector.shape_cast %103 : vector<128xf32> to vector<1x128xf32>
    %cst_35 = arith.constant 0.000000e+00 : f32
    %cst_36 = arith.constant 1.000000e+00 : f32
    %105 = vector.broadcast %cst_35 : f32 to vector<1x128xf32>
    %106 = arith.maximumf %105, %104 : vector<1x128xf32>
    %107 = vector.broadcast %cst_36 : f32 to vector<1x128xf32>
    %108 = arith.minimumf %107, %106 : vector<1x128xf32>
    %109 = vector.extract_strided_slice %96 {offsets = [100, 0], sizes = [1, 128], strides = [1, 1]} : vector<112x128xf32> to vector<1x128xf32>
    %cst_37 = arith.constant 1.000000e+00 : f32
    %110 = vector.broadcast %cst_37 : f32 to vector<1x128xf32>
    %111 = arith.subf %110, %109 : vector<1x128xf32>
    %cst_38 = arith.constant 0.000000e+00 : f32
    %cst_39 = arith.constant 1.000000e+00 : f32
    %112 = vector.broadcast %cst_38 : f32 to vector<1x128xf32>
    %113 = arith.maximumf %112, %111 : vector<1x128xf32>
    %114 = vector.broadcast %cst_39 : f32 to vector<1x128xf32>
    %115 = arith.minimumf %114, %113 : vector<1x128xf32>
    %116 = arith.mulf %20, %108 : vector<1x128xf32>
    %117 = arith.mulf %116, %108 : vector<1x128xf32>
    %cst_40 = arith.constant 0.143455818 : f32
    %118 = vector.broadcast %cst_40 : f32 to vector<1x128xf32>
    %119 = arith.mulf %117, %118 : vector<1x128xf32>
    %cst_41 = arith.constant 1.000000e+00 : f32
    %120 = vector.broadcast %cst_41 : f32 to vector<1x128xf32>
    %121 = arith.subf %120, %115 : vector<1x128xf32>
    %cst_42 = arith.constant 1.000000e-10 : f32
    %122 = vector.broadcast %cst_42 : f32 to vector<1x128xf32>
    %123 = arith.addf %121, %122 : vector<1x128xf32>
    %124 = arith.divf %119, %123 : vector<1x128xf32>
    %125 = arith.mulf %13, %4 : vector<3x128xf32>
    %126 = vector.broadcast %124 : vector<1x128xf32> to vector<3x128xf32>
    %127 = arith.mulf %125, %126 : vector<3x128xf32>
    %c0_43 = arith.constant 0 : index
    %c0_44 = arith.constant 0 : index
    %128 = vector.load %arg3[%c0_43, %c0_44] : memref<12x128xf32, #tpu.memory_space<vmem>>, vector<3x128xf32>
    tpu.vector_store %arg3[%c0_43, %c0_44], %127 {strides = array<i32>} : memref<12x128xf32, #tpu.memory_space<vmem>>, vector<3x128xf32>,
    %c4_45 = arith.constant 4 : index
    %c0_46 = arith.constant 0 : index
    %129 = vector.load %arg3[%c4_45, %c0_46] : memref<12x128xf32, #tpu.memory_space<vmem>>, vector<3x128xf32>
    tpu.vector_store %arg3[%c4_45, %c0_46], %65 {strides = array<i32>} : memref<12x128xf32, #tpu.memory_space<vmem>>, vector<3x128xf32>,
    %130 = arith.addf %127, %65 : vector<3x128xf32>
    %c8_47 = arith.constant 8 : index
    %c0_48 = arith.constant 0 : index
    %131 = vector.load %arg3[%c8_47, %c0_48] : memref<12x128xf32, #tpu.memory_space<vmem>>, vector<3x128xf32>
    tpu.vector_store %arg3[%c8_47, %c0_48], %130 {strides = array<i32>} : memref<12x128xf32, #tpu.memory_space<vmem>>, vector<3x128xf32>,
    return
  }
  func.func @transform_0(%arg0: i32) -> (i32, i32) {
    %c0_i32 = arith.constant 0 : i32
    %c0_i32_0 = arith.constant 0 : i32
    return %c0_i32, %arg0 : i32, i32
  }
  func.func @transform_1(%arg0: i32) -> (i32, i32) {
    %c0_i32 = arith.constant 0 : i32
    %c0_i32_0 = arith.constant 0 : i32
    %c0_i32_1 = arith.constant 0 : i32
    return %c0_i32, %c0_i32_0 : i32, i32
  }
  func.func @transform_2(%arg0: i32) -> (i32, i32) {
    %c0_i32 = arith.constant 0 : i32
    %c0_i32_0 = arith.constant 0 : i32
    return %c0_i32, %arg0 : i32, i32
  }
}

</mosaic_0001>

<bundles_post_ra>
// kernel: tpu_custom_call.1
= control target key start
LH: loop header
LB: loop body
LE: loop exit
PB: predicated region body
PF: predicated region fallthrough
CT: control target
= control target key end

     0   :  { %7 = vsyncpa [#allocation3], 0  ;;  %s1532_s0 = inlined_call_operand.hbm [shape: f32[24,256], index: 0, kind: input, shape index: {}]   ;;  %s1533_s1 = inlined_call_operand.hbm [shape: bf16[112,128], index: 1, kind: input, shape index: {}]   ;;  %s1534_s2 = inlined_call_operand.hbm [shape: f32[12,256], index: 2, kind: output, shape index: {}]  }
   0x1   :  { %9 = vsyncpa [#allocation3 + $0x1], 0 }
   0x2   :  { %10 = vsyncpa [#allocation6], 0 }
   0x3   :  { %11 = vsyncpa [#allocation4], 0 }
   0x4   :  { %13 = vsyncpa [#allocation4 + $0x1], 0  ;;  %s1091_s9 = smov 0   ;;  %s1093_s10 = smov 0  }
   0x5   :  { %s1095_s11 = smov 0   ;;  %s1097_s12 = smov 0  }
   0x6 LB: > { %s1112_s13 = sadd.s32 4294967295, %s1060_s12   ;;  %s699_s14 = sadd.s32 4294967294, %s1060_s12   ;;  %s1060_s12 = sphi %s1097_s12, %s1574_s12   ;;  %s1056_s11 = sphi %s1095_s11, %s1573_s11   ;;  %s1052_s10 = sphi %s1093_s10, %s1572_s10   ;;  %s1048_s9 = sphi %s1091_s9, %s1571_s9  }
   0x7   : > { %s1116_s15 = sadd.s32 1, %s1060_s12   ;;  %s26_s16 = sadd.s32 1, %s1056_s11 }
   0x8   : > { %s23_s17 = ssub.s32 %s1060_s12, %s1116_s15  ;;  %p33_p0 = scmp.ne.s32.totalorder %s1056_s11, %s1052_s10 }
   0x9   : > { %p24_p1 = scmp.eq.s32.totalorder %s23_s17, 0  ;;  %p34_p2 = scmp.eq.s32.totalorder %s1060_s12, 0 }
   0xa   : > { %p39_p3 = scmp.ne.s32.totalorder %s1052_s10, %s1048_s9  ;;  %p1535_p4 = scmp.eq.s32.totalorder %s1112_s13, 0 }
   0xb   : > { %s1128_s18 = scalar_select %p24_p1, %s1056_s11, %s26_s16  }
   0xc   : > { %p1130_p5 = por %p34_p2, %p33_p0  ;;  %p1136_p6 = por %p1535_p4, %p39_p3 }
   0xd   : > { %p84_p7 = scmp.eq.s32.totalorder %s1112_s13, 1  ;;  %p90_p8 = scmp.eq.s32.totalorder %s699_s14, 1 }
   0xe   : > { %s1539_s19 = scalar_select %p1130_p5, 1, 0 }
   0xf   : > { %s1540_s20 = scalar_select %p1136_p6, 1, 0 }
  0x10   : > { %p700_p9 = scmp.ge.s32.totalorder %s1060_s12, 1  ;;  %p97_p10 = scmp.lt.s32.totalorder %s1060_s12, 3 }
  0x11   : > { %p1143_p11 = por %p84_p7, %p33_p0  ;;  %p1147_p12 = por %p90_p8, %p39_p3 }
  0x12   : > { %p1151_p13 = pnand %p700_p9, %p97_p10  ;;  %s1062_s24 = smov [#allocation5]  }
  0x13   : > { %s1541_s21 = scalar_select %p1143_p11, 1, 0 }
  0x14   : > { %s1542_s22 = scalar_select %p1147_p12, 1, 0 }
  0x15   : > { %s1543_s23 = scalar_select %p1151_p13, 1, 0 }
  0x16   : > { %p839_p1 = pneg %p1151_p13  ;;  %s109_s25 = sshll.u32 %s1062_s24, 4  ;;  %s110_s25 = int_to_ptr.vmem [resolvable:$true] %s109_s25 }
  0x17   : > { %s123_s27 = sand.u32 1, %s1056_s11   ;;  %s932_s30 = scalar_lea.hbm %s1533_s1, 896 }
  0x18   : > { %p1159_p2 = pnand %p839_p1, %p1535_p4  ;;  %p933_p7 = scmp.ne.s32.totalorder %s1533_s1, %s932_s30 }
  0x19   : > { %p939_p1 = scmp.lt.u32.totalorder %s932_s30, %s1533_s1 }
  0x1a   : > { %p934_p8 = pneg %p1159_p2 }
  0x1c   : > { %p935_p9 = pnand %p934_p8, %p933_p7 }
  0x1e   : > { %p936_p10 = pneg %p935_p9 }
  0x20   : > { %p941_p4 = pnand %p939_p1, %p936_p10 }
  0x22   : > { %944 = shalt.err (!%p941_p4)
}
  0x23   : > { %s945_s7 = scalar_lea.vmem %s110_s25, 896  ;;  %p953_p11 = scmp.lt.s32.totalorder %s110_s25, %s110_s25 }
  0x24   : > { %p946_p0 = scmp.ne.s32.totalorder %s110_s25, %s945_s7  ;;  %p954_p6 = scmp.lt.s32.totalorder %s945_s7, %s945_s7 }
  0x26   : > { %p948_p3 = pnand %p946_p0, %p934_p8  ;;  %p955_p13 = por %p954_p6, %p953_p11 }
  0x28   : > { %p949_p12 = pneg %p948_p3 }
  0x2a   : > { %p956_p5 = pnand %p955_p13, %p949_p12 }
  0x2c   : > { %959 = shalt.err (!%p956_p5)
}
  0x2d   : > { %s1063_s8 = smov 64   ;;  %s1064_s14 = smov 4  }
  0x2e   : > { %842 = dma.hbm_to_vmem [thread:$0]  (!%p1159_p2), %s1533_s1, 896, %s110_s25, [#allocation6], %s1063_s8, %s1063_s8, %s1064_s14  }
  0x2f   : > { %p1545_p4 = scmp.ne.s32.totalorder %s1539_s19, 0  ;;  %p1546_p7 = scmp.lt.s32.totalorder %s1060_s12, 2 }
  0x30   : > { %s825_s28 = smul.u32 24, %s123_s27  ;;  %s703_s29 = sshll.u32 %s1060_s12, 7 }
  0x31   : > { %p1186_p0 = pnand %p1546_p7, %p1545_p4  ;;  %s1194_s4 = scalar_lea.hbm %s1532_s0, %s703_s29 }
  0x32   : > { %s127_s25 = scalar_lea.vmem [#allocation2], %s825_s28  ;;  %s1198_s26 = scalar_lea.sflag [#allocation3], %s123_s27 }
  0x33   : > { %s133_s19 = sshll.u32 %s127_s25, 4  ;;  %s960_s5 = scalar_lea.hbm %s1194_s4, 384  ;;  %s1196_s19 = int_to_ptr.vmem [resolvable:$true] %s133_s19 }
  0x34   : > { %p961_p5 = scmp.ne.s32.totalorder %s1194_s4, %s960_s5  ;;  %p962_p6 = pneg %p1186_p0 }
  0x35   : > { %s965_s8 = scalar_lea.hbm %s1532_s0, 768  ;;  %p966_p13 = scmp.lt.u32.totalorder %s1194_s4, %s1532_s0 }
  0x36   : > { %p963_p11 = pnand %p962_p6, %p961_p5  ;;  %p967_p2 = scmp.lt.u32.totalorder %s965_s8, %s960_s5 }
  0x37   : > { %p969_p8 = scmp.lt.u32.totalorder %s960_s5, %s1194_s4 }
  0x38   : > { %p964_p12 = pneg %p963_p11  ;;  %p968_p3 = por %p967_p2, %p966_p13 }
  0x3a   : > { %p970_p9 = por %p969_p8, %p968_p3 }
  0x3c   : > { %p971_p10 = pnand %p970_p9, %p964_p12 }
  0x3e   : > { %974 = shalt.err (!%p971_p10)
}
  0x3f   : > { %s975_s27 = scalar_lea.vmem %s1196_s19, 384  ;;  %s1065_s17 = smov [#allocation2]  }
  0x40   : > { %p976_p1 = scmp.ne.s32.totalorder %s1196_s19, %s975_s27  ;;  %s980_s28 = sshll.u32 %s1065_s17, 4  ;;  %s981_s28 = int_to_ptr.vmem [resolvable:$false] %s980_s28 }
  0x41   : > { %s982_s29 = scalar_lea.vmem %s981_s28, 768  ;;  %p983_p5 = scmp.lt.s32.totalorder %s1196_s19, %s981_s28 }
  0x42   : > { %p978_p4 = pnand %p976_p1, %p962_p6  ;;  %p984_p11 = scmp.lt.s32.totalorder %s982_s29, %s975_s27 }
  0x44   : > { %p979_p7 = pneg %p978_p4  ;;  %p985_p13 = por %p984_p11, %p983_p5 }
  0x46   : > { %p986_p2 = pnand %p985_p13, %p979_p7 }
  0x48   : > { %989 = shalt.err (!%p986_p2)
}
  0x49   : > { %s1066_s30 = smov 256   ;;  %s1067_s3 = smov 128  }
  0x4a   : > { %s1068_s25 = smov 8   ;;  %p1548_p6 = scmp.ne.s32.totalorder %s1543_s23, 0 }
  0x4b   : > { %846 = dma.hbm_to_vmem [thread:$0]  (!%p1186_p0), %s1194_s4, 384, %s1196_s19, %s1198_s26, %s1066_s30, %s1067_s3, %s1068_s25  }
  0x4c   : > { %145 = sbr.rel (%p1548_p6) target bundleno = 466 (0x1d2), region = 28  ;;  %s1229_s5 = sand.u32 (!%p1548_p6), 1, %s1052_s10  }
  0x4d   : > { %s826_s6 = smul.u32 (!%p1548_p6), 24, %s1229_s5  ;;  %s148_s7 = scalar_lea.sflag (!%p1548_p6), [#allocation3], %s1229_s5 }
  0x4e   : > { %p1549_p12 = scmp.ne.s32.totalorder (!%p1548_p6), %s1540_s20, 0 }
  0x4f   : > { %s1233_s8 = scalar_lea.vmem (!%p1548_p6), [#allocation2], %s826_s6 }
  0x53   : > { %1035 = dma.done.wait (%p1549_p12), %s148_s7, 384  }
  0x54   : > { %1037 = vsyncadd (%p1549_p12), %s148_s7, 4294966912  ;;  %p1550_p0 = scmp.eq.s32.totalorder %s1112_s13, 0 }
  0x56   : > { %1039 = dma.done.wait (%p1550_p0), [#allocation6], 896   ;;  %p1551_p3 = pmov %p1550_p0 }
  0x57   : > { %v1069_v0 = vmov 0.0   ;;  %vm1070_vm0 = vmmov 0   ;;  %v183_v1 = vld [vmem:[%s1233_s8 + $0x4] sm:$0x1]  ;;  %v188_v11 = vlaneseq  ;;  %v1071_v38 = vmov 1.0|1.0  }
  0x58   : > { %1041 = vsyncadd (%p1551_p3), [#allocation6], 4294966400  ;;  %765 = vmatprep.subr.bf16.mxu0 %v1069_v0  ;;  %809 = vmatprep.subr.bf16.mxu1 %v1069_v0  ;;  %v1250_v2 = vmax.f32 %v183_v1, 0.0001  ;;  %v899_v63 = vld [vmem:[#allocation5] sm:$0xff]   ;;  %s706_s20 = sshll.u32 %s1229_s5, 4 }
  0x59   : > { %781 = vmatprep.mubr.msk.bf16.mxu0 %vm1070_vm0, %v1069_v0  ;;  %797 = vmatprep.mubr.msk.bf16.mxu1 %vm1070_vm0, %v1069_v0  ;;  %v1253_v15 = vshrl.u32 %v188_v11, 7  ;;  %v902_v1 = vld [vmem:[#allocation5 + $0x20] sm:$0xff]   ;;  %s1449_s23 = scalar_lea.vmem [#allocation7], %s706_s20  ;;  %s747_s24 = sshll.u32 %s1112_s13, 7 }
  0x5a   : > { %v268_v3 = vmul.f32 0.25, %v1250_v2  ;;  %v205_v41 = vmul.f32 %v1250_v2, %v1250_v2  ;;  %s616_s4 = sshll.u32 %s1449_s23, 4  ;;  %s1483_s14 = scalar_lea.hbm %s1534_s2, %s747_s24  ;;  %s1485_s4 = int_to_ptr.vmem [resolvable:$true] %s616_s4 }
  0x5b   : > { %v1261_v19 = vadd.s32 8, %v1253_v15  ;;  %v1264_v20 = vadd.s32 16, %v1253_v15  ;;  %v1267_v21 = vadd.s32 24, %v1253_v15  ;;  %v1270_v22 = vsub.s32 0, %v1253_v15  ;;  %s604_s16 = scalar_lea.sflag [#allocation4], %s1229_s5  ;;  %s990_s27 = scalar_lea.vmem %s1485_s4, 256 }
  0x5c   : > { %906 = vrsqrt.f32 %v268_v3  ;;  %vm271_vm1 = vcmp.eq.f32.partialorder %v268_v3, inf  ;;  %v274_v5 = vand.u32 2147483648, %v268_v3  ;;  %vm273_vm2 = vcmp.eq.f32.partialorder %v268_v3, 0.0  ;;  %p991_p8 = scmp.ne.s32.totalorder %s1485_s4, %s990_s27  ;;  %p1568_p9 = scmp.ne.s32.totalorder %s1541_s21, 0 }
  0x5d   : > { %v309_v24 = vand.u32 63, %v1253_v15  ;;  %v1274_v25 = vadd.s32 32, %v1253_v15  ;;  %v1277_v26 = vadd.s32 40, %v1253_v15  ;;  %v310_v28 = vand.u32 63, %v1261_v19  ;;  %s1072_s13 = smov [#allocation7]  }
  0x5e   : > { %v311_v29 = vand.u32 63, %v1264_v20  ;;  %v312_v30 = vand.u32 63, %v1267_v21  ;;  %v1288_v34 = vadd.s32 48, %v1253_v15  ;;  %v1291_v35 = vadd.s32 56, %v1253_v15  ;;  %p992_p10 = pnand %p991_p8, %p1568_p9  ;;  %s994_s17 = sshll.u32 %s1072_s13, 4  ;;  %s995_s17 = int_to_ptr.vmem [resolvable:$false] %s994_s17 }
  0x5f   : > { %v313_v32 = vand.u32 63, %v1274_v25  ;;  %v314_v33 = vand.u32 63, %v1277_v26  ;;  %v1314_v40 = vadd.s32 64, %v1253_v15  ;;  %v1329_v44 = vadd.s32 72, %v1253_v15  ;;  %s996_s28 = scalar_lea.vmem %s995_s17, 512  ;;  %p997_p4 = scmp.lt.s32.totalorder %s1485_s4, %s995_s17 }
  0x60   : > { %v315_v39 = vand.u32 63, %v1288_v34  ;;  %v316_v43 = vand.u32 63, %v1291_v35  ;;  %v1340_v46 = vadd.s32 80, %v1253_v15  ;;  %v1355_v50 = vadd.s32 88, %v1253_v15  ;;  %p993_p1 = pneg %p992_p10  ;;  %p998_p7 = scmp.lt.s32.totalorder %s996_s28, %s990_s27 }
  0x61   : > { %v317_v45 = vand.u32 63, %v1314_v40  ;;  %v318_v49 = vand.u32 63, %v1329_v44  ;;  %v1365_v51 = vadd.s32 96, %v1253_v15  ;;  %v1368_v52 = vadd.s32 104, %v1253_v15 }
  0x62   : > { %v319_v55 = vand.u32 63, %v1340_v46  ;;  %v320_v56 = vand.u32 63, %v1355_v50  ;;  %v307_v57 = vadd.s32 112, %v1253_v15  ;;  %v308_v58 = vadd.s32 120, %v1253_v15  ;;  %p999_p5 = por %p998_p7, %p997_p4 }
  0x63   : > { %v321_v59 = vand.u32 63, %v1365_v51  ;;  %v322_v60 = vand.u32 63, %v1368_v52 }
  0x64   : > { %v323_v61 = vand.u32 63, %v307_v57  ;;  %v324_v62 = vand.u32 63, %v308_v58  ;;  %p1000_p11 = pnand %p999_p5, %p993_p1 }
  0x66   : > { %v907_v4 = vpop.eup %906 }
  0x67   : > { %v270_v6 = vmul.f32 %v907_v4, %v268_v3  ;;  %v904_v4 = vld [vmem:[#allocation5 + $0x28] sm:$0xff]  }
  0x69   : > { %v272_v7 = vsel %vm271_vm1, %v268_v3, %v270_v6  ;;  %v900_v3 = vld [vmem:[#allocation5 + $0x8] sm:$0xff]   ;;  %v905_v6 = vld [vmem:[#allocation5 + $0x30] sm:$0xff]  }
  0x6a   : > { %v275_v8 = vsel %vm273_vm2, %v274_v5, %v272_v7  ;;  %v901_v5 = vld [vmem:[#allocation5 + $0x10] sm:$0xff]   ;;  %v903_v7 = vld [vmem:[#allocation5 + $0x18] sm:$0xff]  }
  0x6b   : > { %908 = vrsqrt.f32 %v275_v8  ;;  %vm278_vm3 = vcmp.eq.f32.partialorder %v275_v8, inf  ;;  %v281_v10 = vand.u32 2147483648, %v275_v8  ;;  %vm280_vm4 = vcmp.eq.f32.partialorder %v275_v8, 0.0 }
  0x75   : > { %v909_v9 = vpop.eup %908 }
  0x76   : > { %v277_v12 = vmul.f32 %v909_v9, %v275_v8  ;;  %v180_v9 = vld [vmem:[%s1233_s8 + $0xc] sm:$0x7] }
  0x78   : > { %v279_v13 = vsel %vm278_vm3, %v275_v8, %v277_v12  ;;  %v179_v8 = vld [vmem:[%s1233_s8 + $0x8] sm:$0x7] }
  0x79   : > { %v282_v14 = vsel %vm280_vm4, %v281_v10, %v279_v13  ;;  %v193_v10 = vmul.f32 %v180_v9, %v179_v8  ;;  %v177_v9 = vld [vmem:[%s1233_s8] sm:$0x7] }
  0x7a   : > { %v1255_v16 = vmul.f32 50.0, %v282_v14 }
  0x7c   : > { %v286_v17 = vfloor.f32 %v1255_v16 }
  0x7e   : > { %v288_v18 = vmin.f32 %v286_v17, 49.0 }
  0x80   : > { %v827_v23 = vtrunc.f32 %v288_v18 }
  0x82   : > { %v828_v27 = vcvt.f32.s32 %v827_v23 }
  0x84   : > { %v1283_v31 = vrot.slane %v828_v27, %v1270_v22 }
  0x86   : > { %vm329_vm5 = vcmp.eq.s32.totalorder %v309_v24, %v1283_v31  ;;  %vm330_vm6 = vcmp.eq.s32.totalorder %v310_v28, %v1283_v31  ;;  %vm1296_vm7 = vcmp.eq.s32.totalorder %v311_v29, %v1283_v31  ;;  %vm1301_vm8 = vcmp.eq.s32.totalorder %v312_v30, %v1283_v31 }
  0x87   : > { %vm730_vm9 = vmpackc.low %vm330_vm6, %vm329_vm5  ;;  %vm1318_vm11 = vcmp.eq.s32.totalorder %v313_v32, %v1283_v31  ;;  %vm1323_vm12 = vcmp.eq.s32.totalorder %v314_v33, %v1283_v31  ;;  %vm1344_vm14 = vcmp.eq.s32.totalorder %v315_v39, %v1283_v31  ;;  %vm1349_vm15 = vcmp.eq.s32.totalorder %v316_v43, %v1283_v31 }
  0x88   : > { %766 = vmatpush3.bf16.msk.msra.mxu0 %vm730_vm9, %v1071_v38  ;;  %817 = vmatpush3.bf16.msk.msra.mxu1 %vm730_vm9, %v1071_v38  ;;  %vm732_vm10 = vmpackc.low %vm1301_vm8, %vm1296_vm7  ;;  %vm1372_vm2 = vcmp.eq.s32.totalorder %v317_v45, %v1283_v31  ;;  %vm1377_vm3 = vcmp.eq.s32.totalorder %v318_v49, %v1283_v31  ;;  %vm339_vm5 = vcmp.eq.s32.totalorder %v319_v55, %v1283_v31  ;;  %v208_v43 = vadd.f32 1e-10, %v205_v41  ;;  %v178_v49 = vld [vmem:[%s1233_s8 + $0x3] sm:$0x1] }
  0x89   : > { %767 = vmatprep.subr.bf16.mxu0 %v1069_v0  ;;  %810 = vmatprep.subr.bf16.mxu1 %v1069_v0  ;;  %vm734_vm13 = vmpackc.low %vm1323_vm12, %vm1318_vm11  ;;  %vm340_vm6 = vcmp.eq.s32.totalorder %v320_v56, %v1283_v31  ;;  %vm341_vm8 = vcmp.eq.s32.totalorder %v321_v59, %v1283_v31  ;;  %vm342_vm9 = vcmp.eq.s32.totalorder %v322_v60, %v1283_v31  ;;  %v212_v56 = vmul.f32 3.1415927, %v205_v41 }
  0x8a   : > { %vm736_vm1 = vmpackc.low %vm1349_vm15, %vm1344_vm14  ;;  %vm343_vm11 = vcmp.eq.s32.totalorder %v323_v61, %v1283_v31  ;;  %vm344_vm12 = vcmp.eq.s32.totalorder %v324_v62, %v1283_v31  ;;  %vm194_vm14 = vcmask 1042432   ;;  %v184_v53 = vmul.f32 %v178_v49, %v178_v49 }
  0x8b   : > { %vm738_vm4 = vmpackc.low %vm1377_vm3, %vm1372_vm2  ;;  %v195_v11 = vsel %vm194_vm14, %v193_v10, 0.0 }
  0x8c   : > { %768 = vmatpush3.bf16.msk.msra.mxu0 %vm732_vm10, %v1071_v38  ;;  %818 = vmatpush3.bf16.msk.msra.mxu1 %vm732_vm10, %v1071_v38  ;;  %vm740_vm7 = vmpackc.low %vm340_vm6, %vm339_vm5  ;;  %v196_v12 = vrot.slane %v195_v11, 4  ;;  %v185_v58 = vadd.f32 1e-10, %v184_v53 }
  0x8d   : > { %769 = vmatprep.subr.bf16.mxu0 %v1069_v0  ;;  %811 = vmatprep.subr.bf16.mxu1 %v1069_v0  ;;  %vm742_vm10 = vmpackc.low %vm342_vm9, %vm341_vm8 }
  0x8e   : > { %v197_v13 = vadd.f32 %v196_v12, %v195_v11 }
  0x90   : > { %770 = vmatpush3.bf16.msk.msra.mxu0 %vm734_vm13, %v1071_v38  ;;  %819 = vmatpush3.bf16.msk.msra.mxu1 %vm734_vm13, %v1071_v38  ;;  %vm744_vm13 = vmpackc.low %vm344_vm12, %vm343_vm11  ;;  %v198_v14 = vrot.slane %v197_v13, 2 }
  0x91   : > { %771 = vmatprep.subr.bf16.mxu0 %v1069_v0  ;;  %812 = vmatprep.subr.bf16.mxu1 %v1069_v0 }
  0x92   : > { %v199_v18 = vadd.f32 %v198_v14, %v197_v13 }
  0x94   : > { %772 = vmatpush3.bf16.msk.msra.mxu0 %vm736_vm1, %v1071_v38  ;;  %820 = vmatpush3.bf16.msk.msra.mxu1 %vm736_vm1, %v1071_v38  ;;  %v200_v23 = vrot.slane %v199_v18, 1 }
  0x95   : > { %773 = vmatprep.subr.bf16.mxu0 %v1069_v0  ;;  %813 = vmatprep.subr.bf16.mxu1 %v1069_v0 }
  0x96   : > { %v201_v24 = vadd.f32 %v200_v23, %v199_v18  ;;  %v182_v23 = vld [vmem:[%s1233_s8 + $0x14] sm:$0x7] }
  0x98   : > { %774 = vmatpush3.bf16.msk.msra.mxu0 %vm738_vm4, %v1071_v38  ;;  %821 = vmatpush3.bf16.msk.msra.mxu1 %vm738_vm4, %v1071_v38  ;;  %v202_v27 = vmax.f32 %v201_v24, 1e-05 }
  0x99   : > { %775 = vmatprep.subr.bf16.mxu0 %v1069_v0  ;;  %814 = vmatprep.subr.bf16.mxu1 %v1069_v0 }
  0x9a   : > { %v1427_v28 = vmin.f32 %v202_v27, 0.99999 }
  0x9c   : > { %776 = vmatpush3.bf16.msk.msra.mxu0 %vm740_vm7, %v1071_v38  ;;  %822 = vmatpush3.bf16.msk.msra.mxu1 %vm740_vm7, %v1071_v38  ;;  %v206_v29 = vmul.f32 %v1427_v28, %v1427_v28  ;;  %v225_v30 = vadd.f32 1e-10, %v1427_v28  ;;  %v244_v62 = vmul.f32 4.0, %v1427_v28  ;;  %vm256_vm3 = vcmp.eq.f32.partialorder %v1427_v28, inf }
  0x9d   : > { %777 = vmatprep.subr.bf16.mxu0 %v1069_v0  ;;  %815 = vmatprep.subr.bf16.mxu1 %v1069_v0  ;;  %vm258_vm4 = vcmp.eq.f32.partialorder %v1427_v28, 0.0  ;;  %vm287_vm7 = vcmp.gt.f32.partialorder %v286_v17, 49.0 }
  0xa0   : > { %778 = vmatpush3.bf16.msk.msra.mxu0 %vm742_vm10, %v1071_v38  ;;  %823 = vmatpush3.bf16.msk.msra.mxu1 %vm742_vm10, %v1071_v38 }
  0xa1   : > { %779 = vmatprep.subr.bf16.mxu0 %v1069_v0  ;;  %816 = vmatprep.subr.bf16.mxu1 %v1069_v0 }
  0xa4   : > { %780 = vmatpush3.bf16.msk.msra.mxu0 %vm744_vm13, %v1071_v38  ;;  %824 = vmatpush3.bf16.msk.msra.mxu1 %vm744_vm13, %v1071_v38 }
  0xa7   : > { %782 = vmatmul.mubr.bf16.vlgmr.msra.gmra.mrb[0].mxu0 %v899_v63  ;;  %798 = vmatmul.mubr.bf16.vlgmr.msra.gmra.mrb[0].mxu1 %v902_v1 }
  0xa8   : > { %785 = vmatprep.mubr.msk.bf16.mxu0 %vm1070_vm0, %v1069_v0  ;;  %801 = vmatprep.mubr.msk.bf16.mxu1 %vm1070_vm0, %v1069_v0 }
  0xaf   : > { %786 = vmatmul.mubr.bf16.gmra.mrb[4].mxu0 %v900_v3  ;;  %802 = vmatmul.mubr.bf16.gmra.mrb[4].mxu1 %v904_v4 }
  0xb0   : > { %789 = vmatprep.mubr.msk.bf16.mxu0 %vm1070_vm0, %v1069_v0  ;;  %805 = vmatprep.mubr.msk.bf16.mxu1 %vm1070_vm0, %v1069_v0 }
  0xb7   : > { %790 = vmatmul.mubr.bf16.gmra.mrb[8].mxu0 %v901_v5  ;;  %806 = vmatmul.mubr.bf16.gmra.mrb[8].mxu1 %v905_v6  ;;  %v245_v5 = vadd.f32 1e-10, %v244_v62 }
  0xb8   : > { %793 = vmatprep.mubr.msk.bf16.mxu0 %vm1070_vm0, %v1069_v0  ;;  %v207_v0 = vsub.f32 1.0, %v206_v29 }
  0xba   : > { %910 = vrsqrt.f32 %v207_v0  ;;  %vm220_vm0 = vcmp.eq.f32.partialorder %v207_v0, inf  ;;  %v223_v33 = vand.u32 2147483648, %v207_v0  ;;  %vm222_vm15 = vcmp.eq.f32.partialorder %v207_v0, 0.0 }
  0xbb   : > { %912 = vrcp.f32 %v225_v30 }
  0xbc   : > { %914 = vrcp.f32 %v208_v43 }
  0xbf   : > { %794 = vmatmul.mubr.bf16.gmra.mrb[12].mxu0 %v903_v7 }
  0xc4   : > { %v911_v31 = vpop.eup %910 }
  0xc5   : > { %v219_v32 = vmul.f32 %v911_v31, %v207_v0  ;;  %v913_v37 = vpop.eup %912 }
  0xc6   : > { %v915_v48 = vpop.eup %914 }
  0xc7   : > { %v221_v36 = vsel %vm220_vm0, %v207_v0, %v219_v32  ;;  %v210_v54 = vmul.f32 %v915_v48, %v207_v0 }
  0xc8   : > { %v224_v38 = vsel %vm222_vm15, %v223_v33, %v221_v36  ;;  %v259_v33 = vand.u32 2147483648, %v1427_v28 }
  0xc9   : > { %v227_v39 = vmul.f32 %v913_v37, %v224_v38  ;;  %v211_v59 = vadd.f32 %v210_v54, %v206_v29 }
  0xcb   : > { %v228_v42 = vmul.f32 %v227_v39, %v1250_v2  ;;  %v213_v2 = vmul.f32 %v212_v56, %v211_v59 }
  0xcd   : > { %v229_v45 = vmul.f32 %v228_v42, %v228_v42  ;;  %v214_v1 = vmul.f32 %v213_v2, %v211_v59 }
  0xcf   : > { %v230_v47 = vadd.f32 1.0, %v229_v45  ;;  %v215_v4 = vadd.f32 1e-10, %v214_v1 }
  0xd1   : > { %916 = vrsqrt.f32 %v230_v47  ;;  %vm233_vm1 = vcmp.eq.f32.partialorder %v230_v47, inf  ;;  %v236_v57 = vand.u32 2147483648, %v230_v47  ;;  %vm235_vm2 = vcmp.eq.f32.partialorder %v230_v47, 0.0 }
  0xd2   : > { %918 = vrcp.f32 %v185_v58 }
  0xdb   : > { %v917_v55 = vpop.eup %916 }
  0xdc   : > { %v232_v60 = vmul.f32 %v917_v55, %v230_v47  ;;  %v919_v6 = vpop.eup %918 }
  0xdd   : > { %v191_v7 = vrot.slane %v919_v6, %v1270_v22 }
  0xde   : > { %v234_v61 = vsel %vm233_vm1, %v230_v47, %v232_v60 }
  0xdf   : > { %v237_v63 = vsel %vm235_vm2, %v236_v57, %v234_v61  ;;  %v1440_v12 = vmul.f32 %v191_v7, %v177_v9 }
  0xe0   : > { %v238_v3 = vadd.f32 1.0, %v237_v63 }
  0xe1   : > { %v248_v29 = vmul.f32 %v1440_v12, %v182_v23 }
  0xe2   : > { %920 = vrcp.f32 %v238_v3 }
  0xe3   : > { %922 = vrcp.f32 %v215_v4 }
  0xe4   : > { %924 = vrcp.f32 %v245_v5 }
  0xe5   : > { %926 = vrsqrt.f32 %v1427_v28 }
  0xec   : > { %v921_v8 = vpop.eup %920 }
  0xed   : > { %v240_v10 = vmul.f32 2.0, %v921_v8  ;;  %v923_v11 = vpop.eup %922 }
  0xee   : > { %v242_v14 = vmul.f32 0.03867, %v923_v11  ;;  %v925_v18 = vpop.eup %924 }
  0xef   : > { %v241_v13 = vmul.f32 %v240_v10, %v240_v10  ;;  %v927_v30 = vpop.eup %926 }
  0xf0   : > { %v255_v32 = vmul.f32 %v927_v30, %v1427_v28 }
  0xf1   : > { %v243_v24 = vmul.f32 %v242_v14, %v241_v13 }
  0xf2   : > { %v257_v36 = vsel %vm256_vm3, %v1427_v28, %v255_v32 }
  0xf3   : > { %v247_v27 = vmul.f32 %v925_v18, %v243_v24  ;;  %v260_v37 = vsel %vm258_vm4, %v259_v33, %v257_v36 }
  0xf4   : > { %928 = vrsqrt.f32 %v260_v37  ;;  %vm263_vm5 = vcmp.eq.f32.partialorder %v260_v37, inf  ;;  %v266_v41 = vand.u32 2147483648, %v260_v37  ;;  %vm265_vm6 = vcmp.eq.f32.partialorder %v260_v37, 0.0 }
  0xf5   : > { %v252_v0 = vrot.slane %v247_v27, %v1270_v22 }
  0xf7   : > { %v1446_v31 = vmul.f32 %v252_v0, %v248_v29 }
  0xf9   : > { %600 = vst [vmem:[%s1449_s23 + $0x4] sm:$0x7] %v1446_v31 }
  0xfe   : > { %v929_v38 = vpop.eup %928 }
  0xff   : > { %v262_v39 = vmul.f32 %v929_v38, %v260_v37 }
 0x101   : > { %v264_v42 = vsel %vm263_vm5, %v260_v37, %v262_v39 }
 0x102   : > { %v267_v43 = vsel %vm265_vm6, %v266_v41, %v264_v42 }
 0x103   : > { %v283_v45 = vmul.f32 100.0, %v267_v43 }
 0x105   : > { %v284_v47 = vfloor.f32 %v283_v45 }
 0x107   : > { %v829_v48 = vtrunc.f32 %v284_v47 }
 0x109   : > { %v830_v49 = vcvt.f32.s32 %v829_v48 }
 0x10b   : > { %v291_v53 = vsel %vm287_vm7, 99, %v830_v49 }
 0x10c   : > { %v533_v54 = vrot.slane %v291_v53, %v1270_v22 }
 0x10e   : > { %vm534_vm8 = vcmp.eq.s32.totalorder %v1253_v15, %v533_v54  ;;  %vm542_vm9 = vcmp.eq.s32.totalorder %v1314_v40, %v533_v54  ;;  %vm535_vm10 = vcmp.eq.s32.totalorder %v1261_v19, %v533_v54  ;;  %vm543_vm11 = vcmp.eq.s32.totalorder %v1329_v44, %v533_v54 }
 0x10f   : > { %vm536_vm12 = vcmp.eq.s32.totalorder %v1264_v20, %v533_v54  ;;  %vm544_vm13 = vcmp.eq.s32.totalorder %v1340_v46, %v533_v54  ;;  %vm537_vm14 = vcmp.eq.s32.totalorder %v1267_v21, %v533_v54  ;;  %vm545_vm0 = vcmp.eq.s32.totalorder %v1355_v50, %v533_v54 }
 0x110   : > { %vm538_vm15 = vcmp.eq.s32.totalorder %v1274_v25, %v533_v54  ;;  %vm546_vm1 = vcmp.eq.s32.totalorder %v1365_v51, %v533_v54  ;;  %vm539_vm2 = vcmp.eq.s32.totalorder %v1277_v26, %v533_v54  ;;  %vm547_vm3 = vcmp.eq.s32.totalorder %v1368_v52, %v533_v54 }
 0x111   : > { %vm540_vm4 = vcmp.eq.s32.totalorder %v1288_v34, %v533_v54  ;;  %vm541_vm5 = vcmp.eq.s32.totalorder %v1291_v35, %v533_v54 }
 0x17a   : > { %v475_v55 = vpop.f32.mrb[0].mxu0  ;;  %v507_v56 = vpop.f32.mrb[0].mxu1 }
 0x17b   : > { %v548_v57 = vsel %vm534_vm8, %v475_v55, 0.0  ;;  %v783_v58 = vpop.f32.mrb[1].mxu0  ;;  %v556_v59 = vsel %vm542_vm9, %v507_v56, 0.0  ;;  %v799_v60 = vpop.f32.mrb[1].mxu1 }
 0x17c   : > { %v478_v2 = vpop.f32.mrb[2].mxu0  ;;  %v510_v16 = vpop.f32.mrb[2].mxu1 }
 0x17d   : > { %v549_v17 = vsel %vm535_vm10, %v478_v2, 0.0  ;;  %v784_v61 = vpop.f32.mrb[3].mxu0  ;;  %v557_v62 = vsel %vm543_vm11, %v510_v16, 0.0  ;;  %v800_v22 = vpop.f32.mrb[3].mxu1 }
 0x17e   : > { %v562_v63 = vadd.f32 %v549_v17, %v548_v57 }
 0x182   : > { %v483_v40 = vpop.f32.mrb[4].mxu0  ;;  %v515_v19 = vpop.f32.mrb[4].mxu1 }
 0x183   : > { %v550_v44 = vsel %vm536_vm12, %v483_v40, 0.0  ;;  %v787_v1 = vpop.f32.mrb[5].mxu0  ;;  %v558_v3 = vsel %vm544_vm13, %v515_v19, 0.0  ;;  %v803_v4 = vpop.f32.mrb[5].mxu1 }
 0x184   : > { %v563_v5 = vadd.f32 %v562_v63, %v550_v44  ;;  %v486_v6 = vpop.f32.mrb[6].mxu0  ;;  %v518_v7 = vpop.f32.mrb[6].mxu1  ;;  %v596_v63 = vsub.s32 4, %v1253_v15 }
 0x185   : > { %v551_v8 = vsel %vm537_vm14, %v486_v6, 0.0  ;;  %v788_v9 = vpop.f32.mrb[7].mxu0  ;;  %v559_v10 = vsel %vm545_vm0, %v518_v7, 0.0  ;;  %v804_v11 = vpop.f32.mrb[7].mxu1 }
 0x186   : > { %v564_v20 = vadd.f32 %v563_v5, %v551_v8 }
 0x18a   : > { %v491_v21 = vpop.f32.mrb[8].mxu0  ;;  %v523_v46 = vpop.f32.mrb[8].mxu1 }
 0x18b   : > { %v552_v50 = vsel %vm538_vm15, %v491_v21, 0.0  ;;  %v791_v13 = vpop.f32.mrb[9].mxu0  ;;  %v560_v14 = vsel %vm546_vm1, %v523_v46, 0.0  ;;  %v807_v18 = vpop.f32.mrb[9].mxu1  ;;  %v583_v43 = vsub.f32 1.0, %v523_v46 }
 0x18c   : > { %v565_v23 = vadd.f32 %v564_v20, %v552_v50  ;;  %v494_v24 = vpop.f32.mrb[10].mxu0  ;;  %v526_v27 = vpop.f32.mrb[10].mxu1 }
 0x18d   : > { %v553_v29 = vsel %vm539_vm2, %v494_v24, 0.0  ;;  %v792_v0 = vpop.f32.mrb[11].mxu0  ;;  %v561_v30 = vsel %vm547_vm3, %v526_v27, 0.0  ;;  %v808_v32 = vpop.f32.mrb[11].mxu1  ;;  %v584_v48 = vmax.f32 %v583_v43, 0.0 }
 0x18e   : > { %v566_v25 = vadd.f32 %v565_v23, %v553_v29 }
 0x18f   : > { %v585_v34 = vmin.f32 %v584_v48, 1.0 }
 0x191   : > { %v589_v35 = vsub.f32 1.0, %v585_v34 }
 0x192   : > { %v499_v51 = vpop.f32.mrb[12].mxu0 }
 0x193   : > { %v554_v26 = vsel %vm540_vm4, %v499_v51, 0.0  ;;  %v795_v33 = vpop.f32.mrb[13].mxu0  ;;  %v590_v58 = vadd.f32 1e-10, %v589_v35 }
 0x194   : > { %v567_v52 = vadd.f32 %v566_v25, %v554_v26  ;;  %v502_v36 = vpop.f32.mrb[14].mxu0 }
 0x195   : > { %v555_v37 = vsel %vm541_vm5, %v502_v36, 0.0  ;;  %v796_v38 = vpop.f32.mrb[15].mxu0  ;;  %930 = vrcp.f32 %v590_v58 }
 0x196   : > { %v568_v39 = vadd.f32 %v567_v52, %v555_v37 }
 0x198   : > { %v569_v41 = vadd.f32 %v568_v39, %v556_v59 }
 0x19a   : > { %v570_v42 = vadd.f32 %v569_v41, %v557_v62  ;;  %v181_v62 = vld [vmem:[%s1233_s8 + $0x10] sm:$0x7] }
 0x19b   : > { %v593_v44 = vmul.f32 %v1440_v12, %v181_v62 }
 0x19c   : > { %v571_v45 = vadd.f32 %v570_v42, %v558_v3 }
 0x19e   : > { %v572_v47 = vadd.f32 %v571_v45, %v559_v10 }
 0x19f   : > { %v931_v40 = vpop.eup %930 }
 0x1a0   : > { %v573_v49 = vadd.f32 %v572_v47, %v560_v14 }
 0x1a2   : > { %v574_v53 = vadd.f32 %v573_v49, %v561_v30 }
 0x1a4   : > { %v575_v55 = vrot.slane %v574_v53, 4 }
 0x1a6   : > { %v576_v56 = vadd.f32 %v575_v55, %v574_v53 }
 0x1a8   : > { %v577_v54 = vrot.slane %v576_v56, 2 }
 0x1aa   : > { %v578_v57 = vadd.f32 %v577_v54, %v576_v56 }
 0x1ac   : > { %v579_v60 = vrot.slane %v578_v57, 1 }
 0x1ae   : > { %v580_v2 = vadd.f32 %v579_v60, %v578_v57 }
 0x1b0   : > { %v581_v59 = vmax.f32 %v580_v2, 0.0 }
 0x1b2   : > { %v582_v16 = vmin.f32 %v581_v59, 1.0 }
 0x1b4   : > { %v586_v17 = vmul.f32 %v582_v16, %v1427_v28 }
 0x1b6   : > { %v587_v61 = vmul.f32 %v586_v17, %v582_v16 }
 0x1b8   : > { %v588_v22 = vmul.f32 0.14345582, %v587_v61 }
 0x1ba   : > { %v592_v19 = vmul.f32 %v931_v40, %v588_v22 }
 0x1bc   : > { %v597_v1 = vrot.slane %v592_v19, %v596_v63 }
 0x1be   : > { %v598_v3 = vmul.f32 %v597_v1, %v593_v44 }
 0x1c0   : > { %599 = vst [vmem:[%s1449_s23] sm:$0x7] %v598_v3  ;;  %v601_v15 = vadd.f32 %v598_v3, %v1446_v31 }
 0x1c2   : > { %602 = vst [vmem:[%s1449_s23 + $0x8] sm:$0x7] %v601_v15 }
 0x1c3   : > { %1003 = shalt.err (!%p1000_p11)
}
 0x1c4   : > { %s1004_s29 = scalar_lea.hbm %s1483_s14, 256  ;;  %s1008_s25 = scalar_lea.hbm %s1534_s2, 512 }
 0x1c5   : > { %p1005_p13 = scmp.ne.s32.totalorder %s1483_s14, %s1004_s29  ;;  %p1009_p12 = scmp.lt.u32.totalorder %s1483_s14, %s1534_s2 }
 0x1c6   : > { %p1010_p0 = scmp.lt.u32.totalorder %s1008_s25, %s1004_s29  ;;  %p1012_p8 = scmp.lt.u32.totalorder %s1004_s29, %s1483_s14 }
 0x1c7   : > { %p1006_p2 = pnand %p1005_p13, %p1568_p9 }
 0x1c8   : > { %p1011_p3 = por %p1010_p0, %p1009_p12 }
 0x1c9   : > { %p1007_p6 = pneg %p1006_p2 }
 0x1ca   : > { %p1013_p10 = por %p1012_p8, %p1011_p3 }
 0x1cc   : > { %p1014_p1 = pnand %p1013_p10, %p1007_p6 }
 0x1ce   : > { %1017 = shalt.err (!%p1014_p1)
}
 0x1cf   : > { %s1073_s8 = smov 128   ;;  %s1074_s20 = smov 256  }
 0x1d0   : > { %s1075_s23 = smov 8  }
 0x1d1   : > { %837 = dma.vmem_to_hbm [thread:$0]  (%p1568_p9), %s1485_s4, 256, %s1483_s14, %s604_s16, %s1073_s8, %s1074_s20, %s1075_s23  }
 0x1d2 PF: > { %s631_s24 = sand.u32 1, %s1048_s9   ;;  %p1569_p4 = scmp.ne.s32.totalorder %s1542_s22, 0 }
 0x1d3   : > { %p1570_p7 = scmp.ge.s32.totalorder %s1060_s12, 2  ;;  %s632_s19 = scalar_lea.sflag [#allocation4], %s631_s24 }
 0x1d5   : > { %p848_p5 = pnand %p1570_p7, %p1569_p4 }
 0x1d7   : > { %1043 = dma.done.wait (!%p848_p5), %s632_s19, 256  }
 0x1d8   : > { %1045 = vsyncadd (!%p848_p5), %s632_s19, 4294967040  ;;  %p16_p11 = scmp.ge.s32.totalorder %s1116_s15, 4   ;;  %s1571_s9 = smov %s1052_s10 }
 0x1d9   : > { %s1572_s10 = smov %s1056_s11  ;;  %s1573_s11 = smov %s1128_s18 }
 0x1da   : > { %s1574_s12 = smov %s1116_s15  ;;  %18 = sbr.rel (!%p16_p11) target bundleno = 6 (0x6), region = 77 }
 0x1e1   :  { %637 = vsyncpa [#allocation3], 1 }
 0x1e2   :  { %639 = vsyncpa [#allocation3 + $0x1], 1 }
 0x1e3   :  { %640 = vsyncpa [#allocation6], 1 }
 0x1e4   :  { %641 = vsyncpa [#allocation4], 1 }
 0x1e5   :  { %643 = vsyncpa [#allocation4 + $0x1], 1 }

</bundles_post_ra>
